<compile_context>
chip_gen: v6e
topology: v6e:2x2x1
jax: 0.10.0
libtpu: 0.0.40
codegen_flags: <defaults>
</compile_context>

<pallas_src>
import math

import jax
import jax.numpy as jnp
from jax.experimental import pallas as pl
from jax.experimental.pallas import tpu as pltpu

# ----------------------------- config ---------------------------------------
B = 2          # batch
S = 8          # sequence length
D = 32         # embed dim
H = 4          # heads
HD = D // H    # head dim


# --------------------------- kernel body ------------------------------------
def _mha_compute(x, add_mask, hmask_ref, wqkv, bqkv, wo, bo):
    """x: (S, E) f32. add_mask: (1, S) additive key mask or None. Returns (S, E)."""
    e = wo.shape[0]

    # Fused QKV projection: one MXU matmul, K=E, N=3E.
    qkv = jnp.dot(x, wqkv, preferred_element_type=jnp.float32) + bqkv   # (S, 3E)
    q = qkv[:, 0 * e:1 * e]          # 1/sqrt(hd) already folded into wqkv/bqkv
    k = qkv[:, 1 * e:2 * e]
    v = qkv[:, 2 * e:3 * e]

    pv = None                        # accumulated "concatenated" head outputs (S, E)
    for h in range(H):               # static unroll over heads
        # precomputed 0/1 mask selecting this head's columns -> full-width
        # contractions, no narrow lane slicing / relayout per head.
        hm = hmask_ref[pl.ds(h, 1), :]                     # (1, E)
        # scores: (S, S) via K=E contraction (zeroed lanes contribute nothing)
        s = jax.lax.dot_general(q * hm, k, (((1,), (1,)), ((), ())),
                                preferred_element_type=jnp.float32)
        if add_mask is not None:
            s = s + add_mask                               # broadcast over query rows
        s = s - jnp.max(s, axis=-1, keepdims=True)
        p = jnp.exp(s)
        p = p * pl.reciprocal(jnp.sum(p, axis=-1, keepdims=True), approx=True)
        # head output lands in its own (zero-disjoint) columns of (S, E)
        c = jnp.dot(p, v * hm, preferred_element_type=jnp.float32)
        pv = c if pv is None else pv + c

    # single output projection over the accumulated head outputs
    return jnp.dot(pv, wo, preferred_element_type=jnp.float32) + bo


def mha_kernel(x_ref, hmask_ref, wqkv_ref, bqkv_ref, wo_ref, bo_ref, o_ref):
    z = _mha_compute(x_ref[0], None, hmask_ref, wqkv_ref[...], bqkv_ref[...],
                     wo_ref[...], bo_ref[...])
    o_ref[0] = z.astype(o_ref.dtype)


def mha_kernel_masked(x_ref, mask_ref, hmask_ref, wqkv_ref, bqkv_ref, wo_ref,
                      bo_ref, o_ref):
    z = _mha_compute(x_ref[0], mask_ref[0], hmask_ref, wqkv_ref[...],
                     bqkv_ref[...], wo_ref[...], bo_ref[...])
    o_ref[0] = z.astype(o_ref.dtype)


# ----------------------------- wrapper ---------------------------------------
def _const_spec(shape):
    # full-array block, identical for every grid step (Pallas skips re-fetch)
    return pl.BlockSpec(shape, lambda b: (0,) * len(shape))


@jax.jit
def mha_forward(x, attn_mask, hmask, w_qkv, b_qkv, wo, bo):
    b_, s_, e_ = x.shape
    x_spec = pl.BlockSpec((1, s_, e_), lambda b: (b, 0, 0))
    o_spec = pl.BlockSpec((1, s_, e_), lambda b: (b, 0, 0))
    w_specs = [_const_spec(hmask.shape), _const_spec(w_qkv.shape),
               _const_spec(b_qkv.shape), _const_spec(wo.shape),
               _const_spec(bo.shape)]

    if attn_mask is None:                      # specialized no-mask path
        kernel = mha_kernel
        in_specs = [x_spec] + w_specs
        args = (x, hmask, w_qkv, b_qkv, wo, bo)
    else:
        mask3 = attn_mask.reshape(b_, 1, s_).astype(jnp.float32)
        kernel = mha_kernel_masked
        in_specs = [x_spec, pl.BlockSpec((1, 1, s_), lambda b: (b, 0, 0))] + w_specs
        args = (x, mask3, hmask, w_qkv, b_qkv, wo, bo)

    return pl.pallas_call(
        kernel,
        out_shape=jax.ShapeDtypeStruct((b_, s_, e_), x.dtype),
        grid_spec=pltpu.PrefetchScalarGridSpec(
            num_scalar_prefetch=0,
            grid=(b_,),
            in_specs=in_specs,
            out_specs=o_spec),
        compiler_params=pltpu.CompilerParams(
            dimension_semantics=("parallel",)),   # 2 TCs on v7x take one batch each
    )(*args)


# --------------------- parameter prep (torch layout -> kernel) ---------------
def prepare_params(in_proj_weight, in_proj_bias, out_w, out_b):
    """torch layout: in_proj_weight (3E,E), in_proj_bias (3E,), out_w (E,E), out_b (E,)."""
    e = out_w.shape[0]
    hd = e // H
    scale = 1.0 / math.sqrt(hd)
    # fold softmax 1/sqrt(head_dim) into the Q projection (static preprocessing)
    col_scale = jnp.concatenate([jnp.full((e,), scale, jnp.float32),
                                 jnp.ones((2 * e,), jnp.float32)])
    w_qkv = (in_proj_weight.T * col_scale[None, :]).astype(jnp.float32)   # (E, 3E)
    b_qkv = (in_proj_bias * col_scale).reshape(1, 3 * e).astype(jnp.float32)
    wo = out_w.T.astype(jnp.float32)                                      # (E, E)
    bo = out_b.reshape(1, e).astype(jnp.float32)
    # 0/1 head-column selection masks, built once on host: hmask[h, c] = 1 iff
    # column c belongs to head h.
    lanes = jnp.arange(e)
    hmask = ((lanes[None, :] // hd) == jnp.arange(H)[:, None]).astype(jnp.float32)
    return hmask, w_qkv, b_qkv, wo, bo


# ------------------------ pure-JAX reference (torch math) --------------------
def ref_mha(x, attn_mask, in_proj_weight, in_proj_bias, out_w, out_b):
    b_, t_, e_ = x.shape
    hd = e_ // H
    qkv = x @ in_proj_weight.T + in_proj_bias
    q, k, v = jnp.split(qkv, 3, axis=-1)
    q = q.reshape(b_, t_, H, hd)
    k = k.reshape(b_, t_, H, hd)
    v = v.reshape(b_, t_, H, hd)
    attn = jnp.einsum("bthd,bThd->bhtT", q, k) / math.sqrt(hd)
    if attn_mask is not None:
        attn = attn + attn_mask.reshape(b_, 1, 1, t_)
    attn = jax.nn.softmax(attn, axis=-1)
    out = jnp.einsum("bhtT,bThd->bthd", attn, v).reshape(b_, t_, e_)
    return out @ out_w.T + out_b


# ---------------------------------- main -------------------------------------
if __name__ == "__main__":
    key = jax.random.PRNGKey(0)
    kx, kw1, kb1, kw2, kb2 = jax.random.split(key, 5)

    x = jax.random.normal(kx, (B, S, D), dtype=jnp.float32)

    # torch-layout parameters (xavier-uniform-ish weights, small nonzero biases
    # to exercise the bias path)
    xav = math.sqrt(6.0 / (3 * D + D))
    in_proj_weight = jax.random.uniform(kw1, (3 * D, D), jnp.float32, -xav, xav)
    in_proj_bias = 0.02 * jax.random.normal(kb1, (3 * D,), jnp.float32)
    obound = math.sqrt(1.0 / D)
    out_w = jax.random.uniform(kw2, (D, D), jnp.float32, -obound, obound)
    out_b = 0.02 * jax.random.normal(kb2, (D,), jnp.float32)

    hmask, w_qkv, b_qkv, wo, bo = prepare_params(in_proj_weight, in_proj_bias,
                                                 out_w, out_b)

    # --- no-mask path (module default) ---
    out = jax.block_until_ready(mha_forward(x, None, hmask, w_qkv, b_qkv, wo, bo))
    ref = ref_mha(x, None, in_proj_weight, in_proj_bias, out_w, out_b)
    assert out.shape == (B, S, D)
    # tolerance loosened vs exact f32 because of the approx (EUP) reciprocal
    assert jnp.allclose(out, ref, atol=5e-3, rtol=5e-3), "no-mask mismatch vs reference"

    # --- additive mask path (mask out the last two keys of batch element 1) ---
    attn_mask = jnp.zeros((B, S), jnp.float32).at[1, S - 2:].set(-1e9)
    out_m = jax.block_until_ready(mha_forward(x, attn_mask, hmask, w_qkv, b_qkv, wo, bo))
    ref_m = ref_mha(x, attn_mask, in_proj_weight, in_proj_bias, out_w, out_b)
    assert jnp.allclose(out_m, ref_m, atol=5e-3, rtol=5e-3), "masked mismatch vs reference"

    print("KERNEL_OK")
</pallas_src>

<mosaic_0001>
module attributes {stable_mosaic.version = 11 : i64} {
  func.func @mha_kernel(%arg0: i32, %arg1: memref<1x8x32xf32, #tpu.memory_space<vmem>>, %arg2: memref<4x32xf32, #tpu.memory_space<vmem>>, %arg3: memref<32x96xf32, #tpu.memory_space<vmem>>, %arg4: memref<1x96xf32, #tpu.memory_space<vmem>>, %arg5: memref<32x32xf32, #tpu.memory_space<vmem>>, %arg6: memref<1x32xf32, #tpu.memory_space<vmem>>, %arg7: memref<1x8x32xf32, #tpu.memory_space<vmem>>) attributes {dimension_semantics = [#tpu.dimension_semantics<parallel>], iteration_bounds = array<i64: 2>, scalar_prefetch = 0 : i64, scratch_operands = 0 : i64, tpu.core_type = #tpu.core_type<tc>, window_params = [{transform_indices = @transform_0, window_bounds = array<i64: 1, 8, 32>}, {pipeline_mode = #tpu.pipeline_mode<synchronous>, transform_indices = @transform_1, window_bounds = array<i64: 4, 32>}, {pipeline_mode = #tpu.pipeline_mode<synchronous>, transform_indices = @transform_2, window_bounds = array<i64: 32, 96>}, {pipeline_mode = #tpu.pipeline_mode<synchronous>, transform_indices = @transform_3, window_bounds = array<i64: 1, 96>}, {pipeline_mode = #tpu.pipeline_mode<synchronous>, transform_indices = @transform_4, window_bounds = array<i64: 32, 32>}, {pipeline_mode = #tpu.pipeline_mode<synchronous>, transform_indices = @transform_5, window_bounds = array<i64: 1, 32>}, {transform_indices = @transform_6, window_bounds = array<i64: 1, 8, 32>}]} {
    %c0 = arith.constant 0 : index
    %c0_0 = arith.constant 0 : index
    %c0_1 = arith.constant 0 : index
    %0 = vector.load %arg1[%c0, %c0_0, %c0_1] : memref<1x8x32xf32, #tpu.memory_space<vmem>>, vector<1x8x32xf32>
    %1 = vector.shape_cast %0 : vector<1x8x32xf32> to vector<8x32xf32>
    %c0_2 = arith.constant 0 : index
    %c0_3 = arith.constant 0 : index
    %2 = vector.load %arg3[%c0_2, %c0_3] : memref<32x96xf32, #tpu.memory_space<vmem>>, vector<32x96xf32>
    %c0_4 = arith.constant 0 : index
    %c0_5 = arith.constant 0 : index
    %3 = vector.load %arg4[%c0_4, %c0_5] : memref<1x96xf32, #tpu.memory_space<vmem>>, vector<1x96xf32>
    %c0_6 = arith.constant 0 : index
    %c0_7 = arith.constant 0 : index
    %4 = vector.load %arg5[%c0_6, %c0_7] : memref<32x32xf32, #tpu.memory_space<vmem>>, vector<32x32xf32>
    %c0_8 = arith.constant 0 : index
    %c0_9 = arith.constant 0 : index
    %5 = vector.load %arg6[%c0_8, %c0_9] : memref<1x32xf32, #tpu.memory_space<vmem>>, vector<1x32xf32>
    %cst = arith.constant dense<0.000000e+00> : vector<8x96xf32>
    %6 = tpu.matmul %1, %2, %cst {dimension_numbers = #tpu.dot_dimension_numbers<[1], [0], [0], [1], [0, 0, 1, 1], [], []>} : vector<8x32xf32>, vector<32x96xf32>, vector<8x96xf32> -> vector<8x96xf32>
    %7 = vector.broadcast %3 : vector<1x96xf32> to vector<8x96xf32>
    %8 = arith.addf %6, %7 : vector<8x96xf32>
    %9 = vector.extract_strided_slice %8 {offsets = [0, 0], sizes = [8, 32], strides = [1, 1]} : vector<8x96xf32> to vector<8x32xf32>
    %10 = vector.extract_strided_slice %8 {offsets = [0, 32], sizes = [8, 32], strides = [1, 1]} : vector<8x96xf32> to vector<8x32xf32>
    %11 = vector.extract_strided_slice %8 {offsets = [0, 64], sizes = [8, 32], strides = [1, 1]} : vector<8x96xf32> to vector<8x32xf32>
    %c0_10 = arith.constant 0 : index
    %c0_11 = arith.constant 0 : index
    %12 = vector.load %arg2[%c0_10, %c0_11] : memref<4x32xf32, #tpu.memory_space<vmem>>, vector<1x32xf32>
    %13 = vector.broadcast %12 : vector<1x32xf32> to vector<8x32xf32>
    %14 = arith.mulf %9, %13 : vector<8x32xf32>
    %cst_12 = arith.constant dense<0.000000e+00> : vector<8x8xf32>
    %15 = tpu.matmul %14, %10, %cst_12 {dimension_numbers = #tpu.dot_dimension_numbers<[1], [1], [0], [0], [0, 0, 1, 0], [], []>} : vector<8x32xf32>, vector<8x32xf32>, vector<8x8xf32> -> vector<8x8xf32>
    %cst_13 = arith.constant dense<0xFF800000> : vector<8xf32>
    %16 = vector.multi_reduction <maximumf>, %15, %cst_13 [1] : vector<8x8xf32> to vector<8xf32>
    %17 = vector.shape_cast %16 : vector<8xf32> to vector<8x1xf32>
    %18 = vector.broadcast %17 : vector<8x1xf32> to vector<8x8xf32>
    %19 = arith.subf %15, %18 : vector<8x8xf32>
    %20 = math.exp %19 : vector<8x8xf32>
    %cst_14 = arith.constant dense<0.000000e+00> : vector<8xf32>
    %21 = vector.multi_reduction <add>, %20, %cst_14 [1] : vector<8x8xf32> to vector<8xf32>
    %22 = vector.shape_cast %21 : vector<8xf32> to vector<8x1xf32>
    %23 = tpu.reciprocal %22 {approx = true} : vector<8x1xf32> -> vector<8x1xf32>
    %24 = vector.broadcast %23 : vector<8x1xf32> to vector<8x8xf32>
    %25 = arith.mulf %20, %24 : vector<8x8xf32>
    %26 = vector.broadcast %12 : vector<1x32xf32> to vector<8x32xf32>
    %27 = arith.mulf %11, %26 : vector<8x32xf32>
    %cst_15 = arith.constant dense<0.000000e+00> : vector<8x32xf32>
    %28 = tpu.matmul %25, %27, %cst_15 {dimension_numbers = #tpu.dot_dimension_numbers<[1], [0], [0], [1], [0, 0, 1, 1], [], []>} : vector<8x8xf32>, vector<8x32xf32>, vector<8x32xf32> -> vector<8x32xf32>
    %c1 = arith.constant 1 : index
    %c0_16 = arith.constant 0 : index
    %29 = vector.load %arg2[%c1, %c0_16] : memref<4x32xf32, #tpu.memory_space<vmem>>, vector<1x32xf32>
    %30 = vector.broadcast %29 : vector<1x32xf32> to vector<8x32xf32>
    %31 = arith.mulf %9, %30 : vector<8x32xf32>
    %cst_17 = arith.constant dense<0.000000e+00> : vector<8x8xf32>
    %32 = tpu.matmul %31, %10, %cst_17 {dimension_numbers = #tpu.dot_dimension_numbers<[1], [1], [0], [0], [0, 0, 1, 0], [], []>} : vector<8x32xf32>, vector<8x32xf32>, vector<8x8xf32> -> vector<8x8xf32>
    %cst_18 = arith.constant dense<0xFF800000> : vector<8xf32>
    %33 = vector.multi_reduction <maximumf>, %32, %cst_18 [1] : vector<8x8xf32> to vector<8xf32>
    %34 = vector.shape_cast %33 : vector<8xf32> to vector<8x1xf32>
    %35 = vector.broadcast %34 : vector<8x1xf32> to vector<8x8xf32>
    %36 = arith.subf %32, %35 : vector<8x8xf32>
    %37 = math.exp %36 : vector<8x8xf32>
    %cst_19 = arith.constant dense<0.000000e+00> : vector<8xf32>
    %38 = vector.multi_reduction <add>, %37, %cst_19 [1] : vector<8x8xf32> to vector<8xf32>
    %39 = vector.shape_cast %38 : vector<8xf32> to vector<8x1xf32>
    %40 = tpu.reciprocal %39 {approx = true} : vector<8x1xf32> -> vector<8x1xf32>
    %41 = vector.broadcast %40 : vector<8x1xf32> to vector<8x8xf32>
    %42 = arith.mulf %37, %41 : vector<8x8xf32>
    %43 = vector.broadcast %29 : vector<1x32xf32> to vector<8x32xf32>
    %44 = arith.mulf %11, %43 : vector<8x32xf32>
    %cst_20 = arith.constant dense<0.000000e+00> : vector<8x32xf32>
    %45 = tpu.matmul %42, %44, %cst_20 {dimension_numbers = #tpu.dot_dimension_numbers<[1], [0], [0], [1], [0, 0, 1, 1], [], []>} : vector<8x8xf32>, vector<8x32xf32>, vector<8x32xf32> -> vector<8x32xf32>
    %46 = arith.addf %28, %45 : vector<8x32xf32>
    %c2 = arith.constant 2 : index
    %c0_21 = arith.constant 0 : index
    %47 = vector.load %arg2[%c2, %c0_21] : memref<4x32xf32, #tpu.memory_space<vmem>>, vector<1x32xf32>
    %48 = vector.broadcast %47 : vector<1x32xf32> to vector<8x32xf32>
    %49 = arith.mulf %9, %48 : vector<8x32xf32>
    %cst_22 = arith.constant dense<0.000000e+00> : vector<8x8xf32>
    %50 = tpu.matmul %49, %10, %cst_22 {dimension_numbers = #tpu.dot_dimension_numbers<[1], [1], [0], [0], [0, 0, 1, 0], [], []>} : vector<8x32xf32>, vector<8x32xf32>, vector<8x8xf32> -> vector<8x8xf32>
    %cst_23 = arith.constant dense<0xFF800000> : vector<8xf32>
    %51 = vector.multi_reduction <maximumf>, %50, %cst_23 [1] : vector<8x8xf32> to vector<8xf32>
    %52 = vector.shape_cast %51 : vector<8xf32> to vector<8x1xf32>
    %53 = vector.broadcast %52 : vector<8x1xf32> to vector<8x8xf32>
    %54 = arith.subf %50, %53 : vector<8x8xf32>
    %55 = math.exp %54 : vector<8x8xf32>
    %cst_24 = arith.constant dense<0.000000e+00> : vector<8xf32>
    %56 = vector.multi_reduction <add>, %55, %cst_24 [1] : vector<8x8xf32> to vector<8xf32>
    %57 = vector.shape_cast %56 : vector<8xf32> to vector<8x1xf32>
    %58 = tpu.reciprocal %57 {approx = true} : vector<8x1xf32> -> vector<8x1xf32>
    %59 = vector.broadcast %58 : vector<8x1xf32> to vector<8x8xf32>
    %60 = arith.mulf %55, %59 : vector<8x8xf32>
    %61 = vector.broadcast %47 : vector<1x32xf32> to vector<8x32xf32>
    %62 = arith.mulf %11, %61 : vector<8x32xf32>
    %cst_25 = arith.constant dense<0.000000e+00> : vector<8x32xf32>
    %63 = tpu.matmul %60, %62, %cst_25 {dimension_numbers = #tpu.dot_dimension_numbers<[1], [0], [0], [1], [0, 0, 1, 1], [], []>} : vector<8x8xf32>, vector<8x32xf32>, vector<8x32xf32> -> vector<8x32xf32>
    %64 = arith.addf %46, %63 : vector<8x32xf32>
    %c3 = arith.constant 3 : index
    %c0_26 = arith.constant 0 : index
    %65 = vector.load %arg2[%c3, %c0_26] : memref<4x32xf32, #tpu.memory_space<vmem>>, vector<1x32xf32>
    %66 = vector.broadcast %65 : vector<1x32xf32> to vector<8x32xf32>
    %67 = arith.mulf %9, %66 : vector<8x32xf32>
    %cst_27 = arith.constant dense<0.000000e+00> : vector<8x8xf32>
    %68 = tpu.matmul %67, %10, %cst_27 {dimension_numbers = #tpu.dot_dimension_numbers<[1], [1], [0], [0], [0, 0, 1, 0], [], []>} : vector<8x32xf32>, vector<8x32xf32>, vector<8x8xf32> -> vector<8x8xf32>
    %cst_28 = arith.constant dense<0xFF800000> : vector<8xf32>
    %69 = vector.multi_reduction <maximumf>, %68, %cst_28 [1] : vector<8x8xf32> to vector<8xf32>
    %70 = vector.shape_cast %69 : vector<8xf32> to vector<8x1xf32>
    %71 = vector.broadcast %70 : vector<8x1xf32> to vector<8x8xf32>
    %72 = arith.subf %68, %71 : vector<8x8xf32>
    %73 = math.exp %72 : vector<8x8xf32>
    %cst_29 = arith.constant dense<0.000000e+00> : vector<8xf32>
    %74 = vector.multi_reduction <add>, %73, %cst_29 [1] : vector<8x8xf32> to vector<8xf32>
    %75 = vector.shape_cast %74 : vector<8xf32> to vector<8x1xf32>
    %76 = tpu.reciprocal %75 {approx = true} : vector<8x1xf32> -> vector<8x1xf32>
    %77 = vector.broadcast %76 : vector<8x1xf32> to vector<8x8xf32>
    %78 = arith.mulf %73, %77 : vector<8x8xf32>
    %79 = vector.broadcast %65 : vector<1x32xf32> to vector<8x32xf32>
    %80 = arith.mulf %11, %79 : vector<8x32xf32>
    %cst_30 = arith.constant dense<0.000000e+00> : vector<8x32xf32>
    %81 = tpu.matmul %78, %80, %cst_30 {dimension_numbers = #tpu.dot_dimension_numbers<[1], [0], [0], [1], [0, 0, 1, 1], [], []>} : vector<8x8xf32>, vector<8x32xf32>, vector<8x32xf32> -> vector<8x32xf32>
    %82 = arith.addf %64, %81 : vector<8x32xf32>
    %cst_31 = arith.constant dense<0.000000e+00> : vector<8x32xf32>
    %83 = tpu.matmul %82, %4, %cst_31 {dimension_numbers = #tpu.dot_dimension_numbers<[1], [0], [0], [1], [0, 0, 1, 1], [], []>} : vector<8x32xf32>, vector<32x32xf32>, vector<8x32xf32> -> vector<8x32xf32>
    %84 = vector.broadcast %5 : vector<1x32xf32> to vector<8x32xf32>
    %85 = arith.addf %83, %84 : vector<8x32xf32>
    %c0_32 = arith.constant 0 : index
    %c0_33 = arith.constant 0 : index
    %c0_34 = arith.constant 0 : index
    %86 = vector.load %arg7[%c0_32, %c0_33, %c0_34] : memref<1x8x32xf32, #tpu.memory_space<vmem>>, vector<1x8x32xf32>
    %87 = vector.shape_cast %86 : vector<1x8x32xf32> to vector<8x32xf32>
    %88 = vector.shape_cast %85 : vector<8x32xf32> to vector<1x8x32xf32>
    tpu.vector_store %arg7[%c0_32, %c0_33, %c0_34], %88 {strides = array<i32>} : memref<1x8x32xf32, #tpu.memory_space<vmem>>, vector<1x8x32xf32>,
    return
  }
  func.func @transform_0(%arg0: i32) -> (i32, i32, i32) {
    %c0_i32 = arith.constant 0 : i32
    %c0_i32_0 = arith.constant 0 : i32
    %c0_i32_1 = arith.constant 0 : i32
    return %arg0, %c0_i32, %c0_i32_0 : i32, i32, i32
  }
  func.func @transform_1(%arg0: i32) -> (i32, i32) {
    %c0_i32 = arith.constant 0 : i32
    %c0_i32_0 = arith.constant 0 : i32
    %c0_i32_1 = arith.constant 0 : i32
    return %c0_i32, %c0_i32_0 : i32, i32
  }
  func.func @transform_2(%arg0: i32) -> (i32, i32) {
    %c0_i32 = arith.constant 0 : i32
    %c0_i32_0 = arith.constant 0 : i32
    %c0_i32_1 = arith.constant 0 : i32
    return %c0_i32, %c0_i32_0 : i32, i32
  }
  func.func @transform_3(%arg0: i32) -> (i32, i32) {
    %c0_i32 = arith.constant 0 : i32
    %c0_i32_0 = arith.constant 0 : i32
    %c0_i32_1 = arith.constant 0 : i32
    return %c0_i32, %c0_i32_0 : i32, i32
  }
  func.func @transform_4(%arg0: i32) -> (i32, i32) {
    %c0_i32 = arith.constant 0 : i32
    %c0_i32_0 = arith.constant 0 : i32
    %c0_i32_1 = arith.constant 0 : i32
    return %c0_i32, %c0_i32_0 : i32, i32
  }
  func.func @transform_5(%arg0: i32) -> (i32, i32) {
    %c0_i32 = arith.constant 0 : i32
    %c0_i32_0 = arith.constant 0 : i32
    %c0_i32_1 = arith.constant 0 : i32
    return %c0_i32, %c0_i32_0 : i32, i32
  }
  func.func @transform_6(%arg0: i32) -> (i32, i32, i32) {
    %c0_i32 = arith.constant 0 : i32
    %c0_i32_0 = arith.constant 0 : i32
    %c0_i32_1 = arith.constant 0 : i32
    return %arg0, %c0_i32, %c0_i32_0 : i32, i32, i32
  }
}

</mosaic_0001>

<bundles_post_ra>
// kernel: mha_forward.1
= control target key start
LH: loop header
LB: loop body
LE: loop exit
PB: predicated region body
PF: predicated region fallthrough
CT: control target
= control target key end

     0   :  { %s2011_s0 = inlined_call_operand.hbm [shape: f32[2,8,32], index: 0, kind: input, shape index: {}]   ;;  %s2012_s1 = inlined_call_operand.hbm [shape: f32[4,32], index: 1, kind: input, shape index: {}]   ;;  %s2013_s2 = inlined_call_operand.hbm [shape: f32[32,96], index: 2, kind: input, shape index: {}]   ;;  %s2014_s3 = inlined_call_operand.vmem [shape: f32[1,96], index: 3, kind: input, shape index: {}]   ;;  %s2015_s4 = inlined_call_operand.hbm [shape: f32[32,32], index: 4, kind: input, shape index: {}]   ;;  %s2016_s5 = inlined_call_operand.vmem [shape: f32[1,32], index: 5, kind: input, shape index: {}]   ;;  %s2017_s6 = inlined_call_operand.hbm [shape: f32[2,8,32], index: 6, kind: output, shape index: {}]  }
   0x1   :  { %2022 = sst [smem:[#allocation15_spill]] %s2012_s1 }
   0x2   :  { %11 = vsyncpa [#allocation3], 0 }
   0x3   :  { %13 = vsyncpa [#allocation3 + $0x1], 0 }
   0x4   :  { %14 = vsyncpa [#allocation6], 0 }
   0x5   :  { %15 = vsyncpa [#allocation9], 0 }
   0x6   :  { %16 = vsyncpa [#allocation4], 0 }
   0x7   :  { %18 = vsyncpa [#allocation4 + $0x1], 0  ;;  %s1740_s21 = smov 0   ;;  %s1742_s22 = smov 0  }
   0x8   :  { %s1744_s23 = smov 0   ;;  %s1746_s24 = smov 0  }
   0x9 LB: > { %s1761_s25 = sadd.s32 4294967295, %s1692_s24   ;;  %s1289_s26 = sadd.s32 4294967294, %s1692_s24   ;;  %s1692_s24 = sphi %s1746_s24, %s2043_s24   ;;  %s1688_s23 = sphi %s1744_s23, %s2042_s23   ;;  %s1684_s22 = sphi %s1742_s22, %s2041_s22   ;;  %s1680_s21 = sphi %s1740_s21, %s2040_s21  }
   0xa   : > { %p44_p0 = scmp.ne.s32.totalorder %s1684_s22, %s1680_s21  ;;  %p2018_p1 = scmp.eq.s32.totalorder %s1761_s25, 0 }
   0xb   : > { %p179_p3 = scmp.eq.s32.totalorder %s1289_s26, 1  ;;  %p1290_p5 = scmp.ge.s32.totalorder %s1692_s24, 1 }
   0xc   : > { %p1770_p4 = por %p2018_p1, %p44_p0  ;;  %p186_p7 = scmp.lt.s32.totalorder %s1692_s24, 3 }
   0xd   : > { %p1775_p6 = por %p179_p3, %p44_p0  ;;  %s1694_s30 = smov [#allocation5]  }
   0xe   : > { %s2023_s27 = scalar_select %p1770_p4, 1, 0 }
   0xf   : > { %s2024_s28 = scalar_select %p1775_p6, 1, 0 }
  0x10   : > { %p1780_p8 = pnand %p1290_p5, %p186_p7  ;;  %s199_s7 = sshll.u32 %s1694_s30, 4  ;;  %s200_s7 = int_to_ptr.vmem [resolvable:$true] %s199_s7 }
  0x11   : > { %s1695_s8 = smov [#allocation7]   ;;  %s1696_s11 = smov [#allocation8]  }
  0x12   : > { %s2025_s29 = scalar_select %p1780_p8, 1, 0 }
  0x13   : > { %p1431_p10 = pneg %p1780_p8  ;;  %s209_s9 = sshll.u32 %s1695_s8, 4  ;;  %s210_s9 = int_to_ptr.vmem [resolvable:$true] %s209_s9 }
  0x14   : > { %s225_s12 = sshll.u32 %s1696_s11, 4  ;;  %s1525_s13 = scalar_lea.vmem %s200_s7, 64  ;;  %s226_s12 = int_to_ptr.vmem [resolvable:$true] %s225_s12 }
  0x15   : > { %p1789_p11 = pnand %p1431_p10, %p2018_p1  ;;  %p1526_p13 = scmp.ne.s32.totalorder %s200_s7, %s1525_s13 }
  0x16   : > { %p1533_p5 = scmp.lt.s32.totalorder %s200_s7, %s200_s7  ;;  %p1534_p7 = scmp.lt.s32.totalorder %s1525_s13, %s1525_s13 }
  0x17   : > { %p1516_p12 = pneg %p1789_p11 }
  0x18   : > { %p1535_p9 = por %p1534_p7, %p1533_p5 }
  0x19   : > { %p1528_p0 = pnand %p1526_p13, %p1516_p12 }
  0x1b   : > { %p1529_p3 = pneg %p1528_p0 }
  0x1d   : > { %p1536_p10 = pnand %p1535_p9, %p1529_p3 }
  0x1f   : > { %1539 = shalt.err (!%p1536_p10)
}
  0x20   : > { %s2027_s1 = sld [smem:[#allocation15_spill]]  ;;  %s1551_s16 = scalar_lea.vmem %s210_s9, 512 }
  0x21   : > { %p1552_p1 = scmp.ne.s32.totalorder %s210_s9, %s1551_s16  ;;  %p1559_p13 = scmp.lt.s32.totalorder %s210_s9, %s210_s9 }
  0x22   : > { %p1560_p0 = scmp.lt.s32.totalorder %s1551_s16, %s1551_s16 }
  0x23   : > { %p1554_p2 = pnand %p1552_p1, %p1516_p12 }
  0x24   : > { %p1561_p4 = por %p1560_p0, %p1559_p13 }
  0x25   : > { %p1555_p6 = pneg %p1554_p2 }
  0x26   : > { %1434 = dma.hbm_to_vmem [thread:$0]  (!%p1789_p11), %s2027_s1, 64, %s200_s7, [#allocation6]  }
  0x27   : > { %p1562_p8 = pnand %p1561_p4, %p1555_p6 }
  0x29   : > { %1565 = shalt.err (!%p1562_p8)
}
  0x2a   : > { %s1697_s17 = smov 128   ;;  %s1698_s18 = smov 8  }
  0x2b   : > { %1437 = dma.hbm_to_vmem [thread:$0]  (!%p1789_p11), %s2013_s2, 512, %s210_s9, [#allocation6], %s1697_s17, %s1697_s17, %s1698_s18  }
  0x2c   : > { %s1577_s26 = scalar_lea.vmem %s226_s12, 512  ;;  %p1585_p3 = scmp.lt.s32.totalorder %s226_s12, %s226_s12 }
  0x2d   : > { %p1578_p9 = scmp.ne.s32.totalorder %s226_s12, %s1577_s26  ;;  %p1586_p5 = scmp.lt.s32.totalorder %s1577_s26, %s1577_s26 }
  0x2f   : > { %p1580_p1 = pnand %p1578_p9, %p1516_p12  ;;  %p1587_p4 = por %p1586_p5, %p1585_p3 }
  0x31   : > { %p1581_p2 = pneg %p1580_p1 }
  0x33   : > { %p1588_p6 = pnand %p1587_p4, %p1581_p2 }
  0x35   : > { %1591 = shalt.err (!%p1588_p6)
}
  0x36   : > { %1440 = dma.hbm_to_vmem [thread:$0]  (!%p1789_p11), %s2015_s4, 512, %s226_s12, [#allocation9], %s1697_s17, %s1697_s17, %s1698_s18  }
  0x37   : > { %s1820_s8 = sadd.s32 1, %s1692_s24   ;;  %s31_s10 = sadd.s32 1, %s1688_s23 }
  0x38   : > { %s28_s9 = ssub.s32 %s1692_s24, %s1820_s8  ;;  %p38_p12 = scmp.ne.s32.totalorder %s1688_s23, %s1684_s22 }
  0x39   : > { %p29_p8 = scmp.eq.s32.totalorder %s28_s9, 0  ;;  %p39_p7 = scmp.eq.s32.totalorder %s1692_s24, 0 }
  0x3a   : > { %p1452_p10 = scmp.lt.s32.totalorder %s1692_s24, 2  ;;  %p2028_p0 = scmp.eq.s32.totalorder %s1761_s25, 1 }
  0x3b   : > { %s1830_s11 = scalar_select %p29_p8, %s1688_s23, %s31_s10  }
  0x3c   : > { %p40_p13 = por %p39_p7, %p38_p12  ;;  %p1834_p9 = por %p2028_p0, %p38_p12 }
  0x3d   : > { %s242_s14 = sand.u32 1, %s1688_s23   ;;  %s1296_s15 = sshll.u32 %s1692_s24, 7 }
  0x3e   : > { %s2029_s13 = scalar_select %p1834_p9, 1, 0 }
  0x3f   : > { %s1295_s12 = sshll.u32 %s242_s14, 3  ;;  %s1843_s18 = scalar_lea.hbm %s2011_s0, %s1296_s15 }
  0x40   : > { %s246_s19 = scalar_lea.vmem [#allocation2], %s1295_s12  ;;  %p1845_p11 = pnand %p1452_p10, %p40_p13 }
  0x41   : > { %s253_s20 = sshll.u32 %s246_s19, 4  ;;  %s243_s30 = scalar_lea.sflag [#allocation3], %s242_s14  ;;  %s254_s20 = int_to_ptr.vmem [resolvable:$true] %s253_s20 }
  0x42   : > { %s1592_s7 = scalar_lea.hbm %s1843_s18, 128  ;;  %p1594_p2 = pneg %p1845_p11 }
  0x43   : > { %p1593_p1 = scmp.ne.s32.totalorder %s1843_s18, %s1592_s7  ;;  %s1597_s15 = scalar_lea.hbm %s2011_s0, 256 }
  0x44   : > { %p1598_p4 = scmp.lt.s32.totalorder %s1843_s18, %s2011_s0  ;;  %p1599_p6 = scmp.lt.s32.totalorder %s1597_s15, %s1592_s7 }
  0x45   : > { %p1595_p3 = pnand %p1594_p2, %p1593_p1 }
  0x46   : > { %p1600_p8 = por %p1599_p6, %p1598_p4 }
  0x47   : > { %p1596_p5 = pneg %p1595_p3 }
  0x49   : > { %p1601_p12 = pnand %p1600_p8, %p1596_p5 }
  0x4b   : > { %1604 = shalt.err (!%p1601_p12)
}
  0x4c   : > { %s1605_s17 = scalar_lea.vmem %s254_s20, 128  ;;  %s1699_s14 = smov [#allocation2]  }
  0x4d   : > { %p1606_p7 = scmp.ne.s32.totalorder %s254_s20, %s1605_s17  ;;  %s1610_s19 = sshll.u32 %s1699_s14, 4  ;;  %s1611_s19 = int_to_ptr.vmem [resolvable:$false] %s1610_s19 }
  0x4e   : > { %s1612_s1 = scalar_lea.vmem %s1611_s19, 256  ;;  %p1613_p0 = scmp.lt.s32.totalorder %s254_s20, %s1611_s19 }
  0x4f   : > { %p1608_p10 = pnand %p1606_p7, %p1594_p2  ;;  %p1614_p1 = scmp.lt.s32.totalorder %s1612_s1, %s1605_s17 }
  0x51   : > { %p1609_p13 = pneg %p1608_p10  ;;  %p1615_p3 = por %p1614_p1, %p1613_p0 }
  0x53   : > { %p1616_p9 = pnand %p1615_p3, %p1609_p13 }
  0x55   : > { %1619 = shalt.err (!%p1616_p9)
}
  0x56   : > { %1444 = dma.hbm_to_vmem [thread:$0]  (!%p1845_p11), %s1843_s18, 128, %s254_s20, %s243_s30  }
  0x57   : > { %p2031_p5 = scmp.ne.s32.totalorder %s2025_s29, 0 }
  0x58   : > { %s1866_s7 = sand.u32 (!%p2031_p5), 1, %s1684_s22   ;;  %p2032_p2 = scmp.ne.s32.totalorder (!%p2031_p5), %s2023_s27, 0 }
  0x59   : > { %262 = sbr.rel (%p2031_p5) target bundleno = 1387 (0x56b), region = 44  ;;  %s1298_s9 = sshll.u32 (!%p2031_p5), %s1866_s7, 3 }
  0x5a   : > { %s265_s10 = scalar_lea.sflag (!%p2031_p5), [#allocation3], %s1866_s7  ;;  %s268_s1 = scalar_lea.vmem (!%p2031_p5), [#allocation2], %s1298_s9 }
  0x5e   : > { %1663 = dma.done.wait (%p2032_p2), %s265_s10, 128  }
  0x5f   : > { %1665 = vsyncadd (%p2032_p2), %s265_s10, 4294967168  ;;  %p2033_p9 = scmp.eq.s32.totalorder %s1761_s25, 0 }
  0x61   : > { %1667 = dma.done.wait (%p2033_p9), [#allocation6], 576   ;;  %p2034_p11 = pmov %p2033_p9 }
  0x62   : > { %p2035_p4 = pmov %p2033_p9 }
  0x63   : > { %1669 = vsyncadd (%p2034_p11), [#allocation6], 4294966720 }
  0x64   : > { %1671 = dma.done.wait (%p2035_p4), [#allocation9], 512   ;;  %p2036_p6 = pmov %p2035_p4 }
  0x65   : > { %v1700_v0 = vmov 0.0   ;;  %vm1701_vm0 = vmmov 0   ;;  %v313_v1 = vld [vmem:[#allocation7 + $0x18] sm:$0xff]  ;;  %v312_v2 = vld [vmem:[#allocation7 + $0x10] sm:$0xff]  ;;  %v311_v3 = vld [vmem:[#allocation7 + $0x8] sm:$0xff]  ;;  %vm326_vm1 = vcmask 261120  }
  0x66   : > { %1673 = vsyncadd (%p2036_p6), [#allocation9], 4294966784  ;;  %1353 = vmatprep.subr.mxu0 %v1700_v0  ;;  %1361 = vmatprep.mubr.msk.f32.mxu0 %vm1701_vm0, %v1700_v0  ;;  %v310_v4 = vld [vmem:[#allocation7] sm:$0xff]  ;;  %v309_v5 = vld [vmem:[%s268_s1] sm:$0xff]  ;;  %s1702_s18 = smov 96   ;;  %vm484_vm2 = vcmask 64512  }
  0x67   : > { %1364 = vmatprep.subr.mxu1 %v1700_v0  ;;  %1366 = vmatprep.mubr.msk.f32.mxu1 %vm1701_vm0, %v1700_v0  ;;  %v1303_v6 = vld [vmem:[%s2014_s3] ss:$0 sm:$0xff]  ;;  %v1305_v10 = vld [vmem:[#allocation5] ss:$0 sm:$0xff]  ;;  %v1313_v11 = vld [vmem:[#allocation5 + $0x2] ss:$0 sm:$0xff] }
  0x68   : > { %1354 = vmatpush3.msra.mxu0 %v313_v1  ;;  %v1308_v15 = vld [vmem:[#allocation5 + $0x1] ss:$0 sm:$0xff]  ;;  %v1317_v16 = vld [vmem:[#allocation5 + $0x3] ss:$0 sm:$0xff]  ;;  %s1703_s20 = smov 64   ;;  %s1324_s15 = sshll.u32 %s1761_s25, 7 }
  0x69   : > { %1355 = vmatprep.subr.mxu0 %v1700_v0  ;;  %s308_s16 = scalar_lea.vmem [#allocation10], %s1298_s9  ;;  %s1973_s19 = scalar_lea.hbm %s2017_s6, %s1324_s15 }
  0x6a   : > { %1356 = vmatpush3.msra.mxu0 %v312_v2  ;;  %s1190_s12 = sshll.u32 %s308_s16, 4  ;;  %s1177_s10 = scalar_lea.sflag [#allocation4], %s1866_s7  ;;  %s1191_s12 = int_to_ptr.vmem [resolvable:$true] %s1190_s12 }
  0x6b   : > { %1357 = vmatprep.subr.mxu0 %v1700_v0  ;;  %s1620_s1 = scalar_lea.vmem %s1191_s12, 128  ;;  %p2037_p12 = scmp.ne.s32.totalorder %s2029_s13, 0 }
  0x6c   : > { %1358 = vmatpush3.msra.mxu0 %v311_v3  ;;  %p1621_p8 = scmp.ne.s32.totalorder %s1191_s12, %s1620_s1  ;;  %s1704_s25 = smov [#allocation10]  }
  0x6d   : > { %1359 = vmatprep.subr.mxu0 %v1700_v0  ;;  %s1624_s9 = sshll.u32 %s1704_s25, 4  ;;  %s1625_s9 = int_to_ptr.vmem [resolvable:$false] %s1624_s9 }
  0x6e   : > { %1360 = vmatpush3.msra.mxu0 %v310_v4  ;;  %p1622_p7 = pnand %p1621_p8, %p2037_p12  ;;  %s1626_s27 = scalar_lea.vmem %s1625_s9, 256 }
  0x6f   : > { %1362 = vmatmul.mubr.msk.f32.vlgmr.msra.gmra.mxu0 %vm326_vm1, %v309_v5  ;;  %1384 = vmatprep.subr.mxu0 %v1700_v0  ;;  %p1627_p13 = scmp.lt.s32.totalorder %s1191_s12, %s1625_s9  ;;  %p1628_p0 = scmp.lt.s32.totalorder %s1626_s27, %s1620_s1 }
  0x70   : > { %1386 = vmatprep.mubr.msk.f32.mxu0 %vm1701_vm0, %v1700_v0  ;;  %p1623_p10 = pneg %p1622_p7 }
  0x71   : > { %p1629_p1 = por %p1628_p0, %p1627_p13 }
  0x73   : > { %p1630_p3 = pnand %p1629_p1, %p1623_p10 }
 0x12f   : > { %v396_v7 = vpop.f32.mrf.mxu0 }
 0x130   : > { %v1900_v8 = vadd.f32 %v1303_v6, %v396_v7 }
 0x131   : > { %v1363_v9 = vpop.f32.mrf.mxu0 }
 0x132   : > { %407 = vrot.lane.b32.xlu0 %v1900_v8, %s1702_s18  ;;  %v405_v13 = vmul.f32 %v1305_v10, %v1900_v8  ;;  %v755_v14 = vmul.f32 %v1313_v11, %v1900_v8  ;;  %v506_v17 = vmul.f32 %v1308_v15, %v1900_v8  ;;  %v928_v18 = vmul.f32 %v1317_v16, %v1900_v8 }
 0x1a4   : > { %v408_v12 = vpop.permute.xlu0 %407 }
 0x1a5   : > { %1365 = vmatpush3.xpose.msk.msra.mxu1 %vm326_vm1, %v408_v12  ;;  %1385 = vmatpush3.xpose.msk.msra.mxu0 %vm326_vm1, %v408_v12 }
 0x1a6   : > { %1369 = vmatprep.subr.mxu1 %v1700_v0  ;;  %1394 = vmatprep.subr.mxu0 %v1700_v0 }
 0x1a8   : > { %1367 = vmatmul.mubr.msk.f32.vlgmr.msra.gmra.mxu1 %vm326_vm1, %v405_v13  ;;  %1387 = vmatmul.mubr.msk.f32.vlgmr.msra.gmra.mxu0 %vm326_vm1, %v755_v14  ;;  %v317_v13 = vld [vmem:[#allocation8 + $0x10] sm:$0xff]  ;;  %v316_v14 = vld [vmem:[#allocation8 + $0x8] sm:$0xff] }
 0x1a9   : > { %1370 = vmatpush3.xpose.msk.msra.mxu1 %vm326_vm1, %v408_v12  ;;  %1395 = vmatpush3.xpose.msk.msra.mxu0 %vm326_vm1, %v408_v12  ;;  %v318_v12 = vld [vmem:[#allocation8 + $0x18] sm:$0xff] }
 0x1aa   : > { %1371 = vmatprep.mubr.msk.f32.mxu1 %vm1701_vm0, %v1700_v0  ;;  %1396 = vmatprep.mubr.msk.f32.mxu0 %vm1701_vm0, %v1700_v0 }
 0x1ab   : > { %1374 = vmatprep.subr.mxu1 %v1700_v0  ;;  %1404 = vmatprep.subr.mxu0 %v1700_v0 }
 0x1ac   : > { %1372 = vmatmul.mubr.msk.f32.vlgmr.msra.gmra.mxu1 %vm326_vm1, %v506_v17  ;;  %1397 = vmatmul.mubr.msk.f32.vlgmr.msra.gmra.mxu0 %vm326_vm1, %v928_v18 }
 0x1ad   : > { %1376 = vmatprep.mubr.msk.f32.mxu1 %vm1701_vm0, %v1700_v0  ;;  %1412 = vmatprep.mubr.msk.f32.mxu0 %vm1701_vm0, %v1700_v0 }
 0x1ae   : > { %1405 = vmatpush3.msra.mxu0 %v318_v12 }
 0x1af   : > { %1406 = vmatprep.subr.mxu0 %v1700_v0 }
 0x1b0   : > { %1407 = vmatpush3.msra.mxu0 %v317_v13 }
 0x1b1   : > { %1408 = vmatprep.subr.mxu0 %v1700_v0 }
 0x1b2   : > { %1409 = vmatpush3.msra.mxu0 %v316_v14 }
 0x1b3   : > { %1410 = vmatprep.subr.mxu0 %v1700_v0 }
 0x268   : > { %v480_v19 = vpop.f32.mrf.mxu1  ;;  %v825_v20 = vpop.f32.mrf.mxu0 }
 0x269   : > { %v485_v21 = vsel %vm484_vm2, %v480_v19, -inf  ;;  %v829_v27 = vsel %vm484_vm2, %v825_v20, -inf }
 0x26a   : > { %486 = vmax.xlane.f32.xlu1 %v485_v21  ;;  %v1368_v22 = vpop.f32.mrf.mxu1  ;;  %v1388_v23 = vpop.f32.mrf.mxu0 }
 0x26c   : > { %v576_v24 = vpop.f32.mrf.mxu1  ;;  %v998_v25 = vpop.f32.mrf.mxu0 }
 0x26d   : > { %v580_v26 = vsel %vm484_vm2, %v576_v24, -inf  ;;  %v1002_v30 = vsel %vm484_vm2, %v998_v25, -inf }
 0x26e   : > { %581 = vmax.xlane.f32.xlu0 %v580_v26  ;;  %v1373_v28 = vpop.f32.mrf.mxu1  ;;  %830 = vmax.xlane.f32.xlu1 %v829_v27  ;;  %v1398_v29 = vpop.f32.mrf.mxu0 }
 0x272   : > { %1003 = vmax.xlane.f32.xlu1 %v1002_v30 }
 0x283   : > { %592 = vrot.lane.b32.xlu1 %v1308_v15, %s1703_s20  ;;  %v315_v15 = vld [vmem:[#allocation8] sm:$0xff] }
 0x284   : > { %1014 = vrot.lane.b32.xlu0 %v1317_v16, %s1703_s20  ;;  %1411 = vmatpush3.msra.mxu0 %v315_v15 }
 0x287   : > { %497 = vrot.lane.b32.xlu1 %v1305_v10, %s1703_s20 }
 0x28b   : > { %841 = vrot.lane.b32.xlu1 %v1313_v11, %s1703_s20 }
 0x2f3   : > { %v487_v31 = vpop.xlane.xlu1 %486 }
 0x2f4   : > { %v488_v32 = vsub.f32 %v480_v19, %v487_v31 }
 0x2f6   : > { %v489_v33 = vmul.f32 1.442695, %v488_v32 }
 0x2f7   : > { %v831_v34 = vpop.xlane.xlu1 %830  ;;  %v582_v44 = vpop.xlane.xlu0 %581 }
 0x2f8   : > { %1498 = vpow2.f32 %v489_v33  ;;  %v832_v43 = vsub.f32 %v825_v20, %v831_v34  ;;  %v583_v45 = vsub.f32 %v576_v24, %v582_v44 }
 0x2fa   : > { %v833_v46 = vmul.f32 1.442695, %v832_v43  ;;  %v584_v48 = vmul.f32 1.442695, %v583_v45 }
 0x2fb   : > { %v1004_v35 = vpop.xlane.xlu1 %1003  ;;  %v1015_v57 = vpop.permute.xlu0 %1014 }
 0x2fc   : > { %1500 = vpow2.f32 %v833_v46  ;;  %v1005_v49 = vsub.f32 %v998_v25, %v1004_v35  ;;  %v1017_v58 = vmul.f32 %v1015_v57, %v1900_v8 }
 0x2fd   : > { %1502 = vpow2.f32 %v584_v48 }
 0x2fe   : > { %v1006_v50 = vmul.f32 1.442695, %v1005_v49 }
 0x2ff   : > { %v593_v36 = vpop.permute.xlu1 %592 }
 0x300   : > { %v595_v37 = vmul.f32 %v593_v36, %v1900_v8  ;;  %1504 = vpow2.f32 %v1006_v50 }
 0x302   : > { %597 = vrot.lane.b32.xlu1 %v595_v37, %s1703_s20 }
 0x303   : > { %v498_v38 = vpop.permute.xlu1 %497 }
 0x304   : > { %v500_v47 = vmul.f32 %v498_v38, %v1900_v8 }
 0x305   : > { %v1499_v39 = vpop.eup %1498 }
 0x306   : > { %v491_v40 = vsel %vm484_vm2, %v1499_v39, 0.0 }
 0x307   : > { %492 = vadd.xlane.f32.xlu0 %v491_v40  ;;  %v842_v41 = vpop.permute.xlu1 %841 }
 0x308   : > { %v844_v42 = vmul.f32 %v842_v41, %v1900_v8 }
 0x309   : > { %v1501_v51 = vpop.eup %1500 }
 0x30a   : > { %846 = vrot.lane.b32.xlu1 %v844_v42, %s1703_s20  ;;  %v835_v52 = vsel %vm484_vm2, %v1501_v51, 0.0  ;;  %v1503_v53 = vpop.eup %1502 }
 0x30b   : > { %v586_v54 = vsel %vm484_vm2, %v1503_v53, 0.0 }
 0x30d   : > { %v1505_v55 = vpop.eup %1504 }
 0x30e   : > { %v1008_v56 = vsel %vm484_vm2, %v1505_v55, 0.0 }
 0x31d   : > { %674 = vrot.lane.b32.xlu0 %v500_v47, %s1703_s20 }
 0x32e   : > { %836 = vadd.xlane.f32.xlu1 %v835_v52 }
 0x332   : > { %587 = vadd.xlane.f32.xlu1 %v586_v54 }
 0x336   : > { %1009 = vadd.xlane.f32.xlu1 %v1008_v56 }
 0x347   : > { %1019 = vrot.lane.b32.xlu1 %v1017_v58, %s1703_s20 }
 0x374   : > { %v598_v59 = vpop.permute.xlu1 %597 }
 0x375   : > { %1375 = vmatpush3.msra.mxu1 %v598_v59 }
 0x376   : > { %1379 = vmatprep.subr.mxu1 %v1700_v0 }
 0x37c   : > { %v847_v60 = vpop.permute.xlu1 %846 }
 0x390   : > { %v493_v62 = vpop.xlane.xlu0 %492 }
 0x394   : > { %v675_v5 = vpop.permute.xlu0 %674 }
 0x3b7   : > { %v837_v61 = vpop.xlane.xlu1 %836 }
 0x3bb   : > { %v588_v63 = vpop.xlane.xlu1 %587 }
 0x3bc   : > { %1506 = vrcp.f32 %v588_v63 }
 0x3bd   : > { %1508 = vrcp.f32 %v493_v62 }
 0x3be   : > { %1510 = vrcp.f32 %v837_v61 }
 0x3bf   : > { %v1010_v1 = vpop.xlane.xlu1 %1009 }
 0x3c0   : > { %1512 = vrcp.f32 %v1010_v1 }
 0x3c3   : > { %v1020_v10 = vpop.permute.xlu1 %1019 }
 0x3c9   : > { %v1507_v2 = vpop.eup %1506 }
 0x3ca   : > { %v590_v3 = vmul.f32 %v1507_v2, %v1503_v53  ;;  %v1509_v4 = vpop.eup %1508 }
 0x3cb   : > { %v495_v6 = vmul.f32 %v1509_v4, %v1499_v39  ;;  %v1511_v7 = vpop.eup %1510 }
 0x3cc   : > { %1377 = vmatmul.mubr.msk.f32.vlgmr.msra.gmra.mxu1 %vm484_vm2, %v590_v3  ;;  %v839_v8 = vmul.f32 %v1511_v7, %v1501_v51 }
 0x3cd   : > { %1380 = vmatpush3.msra.mxu1 %v675_v5  ;;  %1381 = vmatprep.mubr.msk.f32.mxu1 %vm1701_vm0, %v1700_v0  ;;  %v1513_v9 = vpop.eup %1512 }
 0x3ce   : > { %1389 = vmatprep.subr.mxu1 %v1700_v0  ;;  %v1012_v11 = vmul.f32 %v1513_v9, %v1505_v55 }
 0x3d0   : > { %1382 = vmatmul.mubr.msk.f32.vlgmr.msra.gmra.mxu1 %vm484_vm2, %v495_v6 }
 0x3d1   : > { %1390 = vmatpush3.msra.mxu1 %v847_v60  ;;  %1391 = vmatprep.mubr.msk.f32.mxu1 %vm1701_vm0, %v1700_v0 }
 0x3d2   : > { %1399 = vmatprep.subr.mxu1 %v1700_v0 }
 0x3d4   : > { %1392 = vmatmul.mubr.msk.f32.vlgmr.msra.gmra.mxu1 %vm484_vm2, %v839_v8 }
 0x3d5   : > { %1400 = vmatpush3.msra.mxu1 %v1020_v10  ;;  %1401 = vmatprep.mubr.msk.f32.mxu1 %vm1701_vm0, %v1700_v0  ;;  %v1321_v0 = vld [vmem:[%s2016_s5] ss:$0 sm:$0xff] }
 0x3d8   : > { %1402 = vmatmul.mubr.msk.f32.vlgmr.msra.gmra.mxu1 %vm484_vm2, %v1012_v11 }
 0x48c   : > { %v669_v16 = vpop.f32.mrf.mxu1 }
 0x48e   : > { %v1378_v17 = vpop.f32.mrf.mxu1 }
 0x490   : > { %v746_v18 = vpop.f32.mrf.mxu1 }
 0x491   : > { %v747_v21 = vadd.f32 %v746_v18, %v669_v16 }
 0x492   : > { %v1383_v19 = vpop.f32.mrf.mxu1 }
 0x494   : > { %v918_v20 = vpop.f32.mrf.mxu1 }
 0x495   : > { %v922_v23 = vadd.f32 %v918_v20, %v747_v21 }
 0x496   : > { %v1393_v22 = vpop.f32.mrf.mxu1 }
 0x498   : > { %v1091_v24 = vpop.f32.mrf.mxu1 }
 0x499   : > { %v1095_v25 = vadd.f32 %v1091_v24, %v922_v23 }
 0x49a   : > { %v1403_v26 = vpop.f32.mrf.mxu1 }
 0x49b   : > { %1413 = vmatmul.mubr.msk.f32.vlgmr.msra.gmra.mxu0 %vm326_vm1, %v1095_v25 }
 0x55b   : > { %v1171_v27 = vpop.f32.mrf.mxu0 }
 0x55c   : > { %v1172_v28 = vadd.f32 %v1321_v0, %v1171_v27 }
 0x55d   : > { %v1414_v29 = vpop.f32.mrf.mxu0 }
 0x55e   : > { %1175 = vst.msk [vmem:[%s308_s16] sm:$0xff] %vm326_vm1, %v1172_v28 }
 0x55f   : > { %1633 = shalt.err (!%p1630_p3)
}
 0x560   : > { %s1634_s29 = scalar_lea.hbm %s1973_s19, 128  ;;  %s1638_s20 = scalar_lea.hbm %s2017_s6, 256 }
 0x561   : > { %p1635_p5 = scmp.ne.s32.totalorder %s1973_s19, %s1634_s29  ;;  %p1639_p11 = scmp.lt.s32.totalorder %s1973_s19, %s2017_s6 }
 0x562   : > { %p1640_p4 = scmp.lt.s32.totalorder %s1638_s20, %s1634_s29 }
 0x563   : > { %p1636_p2 = pnand %p1635_p5, %p2037_p12 }
 0x564   : > { %p1641_p6 = por %p1640_p4, %p1639_p11 }
 0x565   : > { %p1637_p9 = pneg %p1636_p2 }
 0x567   : > { %p1642_p8 = pnand %p1641_p6, %p1637_p9 }
 0x569   : > { %1645 = shalt.err (!%p1642_p8)
}
 0x56a   : > { %1429 = dma.vmem_to_hbm [thread:$0]  (%p2037_p12), %s1191_s12, 128, %s1973_s19, %s1177_s10  }
 0x56b PF: > { %s1202_s15 = sand.u32 1, %s1680_s21   ;;  %p2038_p7 = scmp.ne.s32.totalorder %s2024_s28, 0 }
 0x56c   : > { %p2039_p10 = scmp.ge.s32.totalorder %s1692_s24, 2  ;;  %s1203_s16 = scalar_lea.sflag [#allocation4], %s1202_s15 }
 0x56e   : > { %p1446_p13 = pnand %p2039_p10, %p2038_p7 }
 0x570   : > { %p1447_p0 = pneg %p1446_p13 }
 0x572   : > { %1675 = dma.done.wait (%p1447_p0), %s1203_s16, 128  }
 0x573   : > { %1677 = vsyncadd (%p1447_p0), %s1203_s16, 4294967168  ;;  %p21_p1 = scmp.ge.s32.totalorder %s1820_s8, 4   ;;  %s2040_s21 = smov %s1684_s22 }
 0x574   : > { %s2041_s22 = smov %s1688_s23  ;;  %s2042_s23 = smov %s1830_s11 }
 0x575   : > { %s2043_s24 = smov %s1820_s8  ;;  %23 = sbr.rel (!%p21_p1) target bundleno = 9 (0x9), region = 101 }
 0x57a   :  { %1208 = vsyncpa [#allocation3], 1 }
 0x57b   :  { %1210 = vsyncpa [#allocation3 + $0x1], 1 }
 0x57c   :  { %1211 = vsyncpa [#allocation6], 1 }
 0x57d   :  { %1212 = vsyncpa [#allocation9], 1 }
 0x57e   :  { %1213 = vsyncpa [#allocation4], 1 }
 0x57f   :  { %1215 = vsyncpa [#allocation4 + $0x1], 1 }

</bundles_post_ra>
